<compile_context>
chip_gen: v5e
topology: v5e:2x2
jax: 0.10.0
libtpu: 0.0.40
codegen_flags: <defaults>
</compile_context>

<pallas_src>
from functools import lru_cache

import jax
import jax.numpy as jnp
from jax.experimental import pallas as pl
from jax.experimental.pallas import tpu as pltpu

# scaleFactors.v1FullWaveRectified (deterministic, from _DEFAULT_PARAMETERS)
_V1_FULL_WAVE_RECTIFIED_SCALE = 1.9262519669114633  # Python float -> literal

_MIB = 1024 * 1024
_MIN_BLOCK_BYTES = 1 * _MIB      # per-tensor block floor (roofline sweet spot)
_MAX_BLOCK_BYTES = 4 * _MIB      # diminishing returns beyond this
_SPLIT_BYTES = 2 * _MIB          # split single-block slabs bigger than this
_WIDE_CANDIDATES = (4096, 2048, 1024)


@lru_cache(maxsize=1)
def _vmem_config():
    """(total double-buffered block budget, vmem_limit_bytes), per generation."""
    try:
        vmem = int(pltpu.get_tpu_info().vmem_capacity_bytes)
    except Exception:
        vmem = 64 * _MIB  # conservative default (v7x-class)
    if vmem >= 96 * _MIB:          # v5e / v6e: 128 MiB physical VMEM
        return 48 * _MIB, 64 * _MIB
    return 24 * _MIB, 32 * _MIB    # v7x: 64 MiB physical VMEM


def _max_fused_per_call() -> int:
    budget, _ = _vmem_config()
    return max(1, budget // (4 * _MIN_BLOCK_BYTES))


def _sublane_multiple(itemsize: int) -> int:
    # rows per full vreg tile: f32 -> 8, bf16/f16 -> 16, int8/fp8 -> 32
    return max(8, 32 // max(itemsize, 1))


def _per_tensor_block_bytes(n_tensors: int, budget: int) -> int:
    b = budget // (4 * n_tensors)               # 2 bufs x (in + out) per tensor
    return max(_MIN_BLOCK_BYTES, min(b, _MAX_BLOCK_BYTES))


def _choose_2d_geometry(n: int, itemsize: int, n_tensors: int, budget: int):
    """Geometry for the common case n % 1024 == 0: lane-dense 2-D slab."""
    width = 1024
    for w in _WIDE_CANDIDATES:
        if n % w == 0:
            width = w
            break
    rows = n // width
    sub = _sublane_multiple(itemsize)

    block_bytes = _per_tensor_block_bytes(n_tensors, budget)
    target_rows = max(sub, (block_bytes // (width * itemsize)) // sub * sub)

    slab_bytes = n * itemsize
    if rows <= target_rows:
        if slab_bytes > _SPLIT_BYTES and rows >= 2 * sub:
            # Force grid >= 2 so both TensorCores work on v7x.
            half = -(-rows // 2)
            block_rows = ((half + sub - 1) // sub) * sub
        else:
            block_rows = rows          # full extent -> always a legal block dim
    else:
        block_rows = target_rows       # multiple of sublane tile; tail masked
    grid = -(-rows // block_rows)
    return width, rows, block_rows, grid


def _choose_1d_geometry(n: int, itemsize: int, n_tensors: int, budget: int):
    """Fallback for n not a multiple of 1024: flat 1-D blocks, masked tail."""
    block_bytes = _per_tensor_block_bytes(n_tensors, budget)
    block = max(1024, (block_bytes // itemsize) // 1024 * 1024)
    if n <= block:
        if n * itemsize > _SPLIT_BYTES and n >= 2048:
            # Split into two blocks so both TensorCores work on v7x.
            block = ((-(-n // 2)) + 1023) // 1024 * 1024
        else:
            block = n                  # full extent -> legal block dim
    grid = -(-n // block)
    return block, grid


def _make_fwr_kernel(n_tensors: int):
    def kernel(*refs):
        in_refs = refs[:n_tensors]
        out_refs = refs[n_tensors:]
        for x_ref, o_ref in zip(in_refs, out_refs):
            x = x_ref[...].astype(jnp.float32)          # square + scale in f32
            o_ref[...] = (x * x * _V1_FULL_WAVE_RECTIFIED_SCALE).astype(o_ref.dtype)
    return kernel


def _fwr_pallas_call(slabs, spec, grid: int, vmem_limit: int):
    n_tensors = len(slabs)
    out = pl.pallas_call(
        _make_fwr_kernel(n_tensors),
        out_shape=tuple(jax.ShapeDtypeStruct(s.shape, s.dtype) for s in slabs),
        grid_spec=pltpu.PrefetchScalarGridSpec(
            num_scalar_prefetch=0,
            grid=(grid,),
            in_specs=[spec] * n_tensors,
            out_specs=tuple([spec] * n_tensors),
        ),
        compiler_params=pltpu.CompilerParams(
            dimension_semantics=("parallel",),
            vmem_limit_bytes=vmem_limit,
        ),
    )(*slabs)
    return out if isinstance(out, (tuple, list)) else (out,)


@jax.jit
def _fused_forward(*xs):
    """x**2 * scale for tensors sharing element count and dtype, one kernel."""
    n = xs[0].size
    if n == 0:
        return tuple(jnp.asarray(x) for x in xs)
    itemsize = jnp.dtype(xs[0].dtype).itemsize
    budget, vmem_limit = _vmem_config()

    flats = [x.reshape(-1) for x in xs]
    if n % 1024 == 0:
        width, rows, block_rows, grid = _choose_2d_geometry(
            n, itemsize, len(xs), budget)
        slabs = [f.reshape(rows, width) for f in flats]
        spec = pl.BlockSpec((block_rows, width), lambda i: (i, 0))
    else:
        block, grid = _choose_1d_geometry(n, itemsize, len(xs), budget)
        slabs = flats
        spec = pl.BlockSpec((block,), lambda i: (i,))

    outs = _fwr_pallas_call(slabs, spec, grid, vmem_limit)
    return tuple(o.reshape(x.shape) for x, o in zip(xs, outs))


def full_wave_rectification(inputs):
    """Pallas equivalent of FullWaveRectification.forward(list[Tensor])."""
    if not inputs:
        return []
    arrays = [jnp.asarray(x) for x in inputs]
    for a in arrays:
        if not jnp.issubdtype(a.dtype, jnp.floating):
            raise TypeError(f"full_wave_rectification expects floating inputs, "
                            f"got {a.dtype}")
        if a.dtype == jnp.float64:
            raise TypeError("float64 inputs are not supported (kernel computes "
                            "in float32); cast explicitly if the downcast is ok")

    # Group by (element count, dtype): every group is fused into one launch,
    # chunked so per-tensor blocks stay >= 1 MiB without overflowing VMEM.
    groups: dict = {}
    for idx, a in enumerate(arrays):
        groups.setdefault((a.size, str(a.dtype)), []).append(idx)

    max_fused = _max_fused_per_call()
    results = [None] * len(arrays)
    for idxs in groups.values():
        for start in range(0, len(idxs), max_fused):
            chunk = idxs[start:start + max_fused]
            outs = _fused_forward(*[arrays[i] for i in chunk])
            for i, o in zip(chunk, outs):
                results[i] = o
    return results


if __name__ == "__main__":
    key = jax.random.PRNGKey(0)
    k1, k2, k3 = jax.random.split(key, 3)

    # Small shapes consistent with NCHW conv-stage activations.
    x1 = jax.random.normal(k1, (2, 4, 16, 16), dtype=jnp.float32)
    x2 = jax.random.normal(k2, (2, 4, 16, 16), dtype=jnp.float32)
    # Non-128-multiple size -> exercises the 1-D masked-tail path (no padding).
    x3 = jax.random.normal(k3, (3, 5, 7), dtype=jnp.float32)

    def ref_fn(x):
        return x ** 2 * jnp.float32(_V1_FULL_WAVE_RECTIFIED_SCALE)

    # Fused same-shape path.
    outs = full_wave_rectification([x1, x2])
    outs = [jax.block_until_ready(o) for o in outs]
    for x, o in zip([x1, x2], outs):
        assert o.shape == x.shape and o.dtype == x.dtype
        assert jnp.allclose(o, ref_fn(x), rtol=1e-6, atol=1e-6)

    # Mixed-shape list -> grouped launches, order preserved.
    mixed_in = [x1, x3, x2]
    mixed_out = full_wave_rectification(mixed_in)
    mixed_out = [jax.block_until_ready(o) for o in mixed_out]
    for x, o in zip(mixed_in, mixed_out):
        assert o.shape == x.shape and o.dtype == x.dtype
        assert jnp.allclose(o, ref_fn(x), rtol=1e-6, atol=1e-6)

    print("KERNEL_OK")
</pallas_src>

<mosaic_0001>
module attributes {stable_mosaic.version = 11 : i64} {
  func.func @kernel(%arg0: i32, %arg1: memref<1x2048xf32, #tpu.memory_space<vmem>>, %arg2: memref<1x2048xf32, #tpu.memory_space<vmem>>, %arg3: memref<1x2048xf32, #tpu.memory_space<vmem>>, %arg4: memref<1x2048xf32, #tpu.memory_space<vmem>>) attributes {dimension_semantics = [#tpu.dimension_semantics<parallel>], iteration_bounds = array<i64: 1>, scalar_prefetch = 0 : i64, scratch_operands = 0 : i64, tpu.core_type = #tpu.core_type<tc>, window_params = [{transform_indices = @transform_0, window_bounds = array<i64: 1, 2048>}, {transform_indices = @transform_1, window_bounds = array<i64: 1, 2048>}, {transform_indices = @transform_2, window_bounds = array<i64: 1, 2048>}, {transform_indices = @transform_3, window_bounds = array<i64: 1, 2048>}]} {
    %c0 = arith.constant 0 : index
    %c0_0 = arith.constant 0 : index
    %0 = vector.load %arg1[%c0, %c0_0] : memref<1x2048xf32, #tpu.memory_space<vmem>>, vector<1x2048xf32>
    %1 = arith.mulf %0, %0 : vector<1x2048xf32>
    %cst = arith.constant 1.92625201 : f32
    %2 = vector.broadcast %cst : f32 to vector<1x2048xf32>
    %3 = arith.mulf %1, %2 : vector<1x2048xf32>
    %c0_1 = arith.constant 0 : index
    %c0_2 = arith.constant 0 : index
    %4 = vector.load %arg3[%c0_1, %c0_2] : memref<1x2048xf32, #tpu.memory_space<vmem>>, vector<1x2048xf32>
    tpu.vector_store %arg3[%c0_1, %c0_2], %3 {strides = array<i32>} : memref<1x2048xf32, #tpu.memory_space<vmem>>, vector<1x2048xf32>,
    %c0_3 = arith.constant 0 : index
    %c0_4 = arith.constant 0 : index
    %5 = vector.load %arg2[%c0_3, %c0_4] : memref<1x2048xf32, #tpu.memory_space<vmem>>, vector<1x2048xf32>
    %6 = arith.mulf %5, %5 : vector<1x2048xf32>
    %cst_5 = arith.constant 1.92625201 : f32
    %7 = vector.broadcast %cst_5 : f32 to vector<1x2048xf32>
    %8 = arith.mulf %6, %7 : vector<1x2048xf32>
    %c0_6 = arith.constant 0 : index
    %c0_7 = arith.constant 0 : index
    %9 = vector.load %arg4[%c0_6, %c0_7] : memref<1x2048xf32, #tpu.memory_space<vmem>>, vector<1x2048xf32>
    tpu.vector_store %arg4[%c0_6, %c0_7], %8 {strides = array<i32>} : memref<1x2048xf32, #tpu.memory_space<vmem>>, vector<1x2048xf32>,
    return
  }
  func.func @transform_0(%arg0: i32) -> (i32, i32) {
    %c0_i32 = arith.constant 0 : i32
    %c0_i32_0 = arith.constant 0 : i32
    return %arg0, %c0_i32 : i32, i32
  }
  func.func @transform_1(%arg0: i32) -> (i32, i32) {
    %c0_i32 = arith.constant 0 : i32
    %c0_i32_0 = arith.constant 0 : i32
    return %arg0, %c0_i32 : i32, i32
  }
  func.func @transform_2(%arg0: i32) -> (i32, i32) {
    %c0_i32 = arith.constant 0 : i32
    %c0_i32_0 = arith.constant 0 : i32
    return %arg0, %c0_i32 : i32, i32
  }
  func.func @transform_3(%arg0: i32) -> (i32, i32) {
    %c0_i32 = arith.constant 0 : i32
    %c0_i32_0 = arith.constant 0 : i32
    return %arg0, %c0_i32 : i32, i32
  }
}

</mosaic_0001>

<bundles_post_ra>
// kernel: _fused_forward.1
= control target key start
LH: loop header
LB: loop body
LE: loop exit
PB: predicated region body
PF: predicated region fallthrough
CT: control target
= control target key end

     0   :  { %s81_s0 = inlined_call_operand.vmem [shape: f32[1,2048], index: 0, kind: input, shape index: {}]   ;;  %s82_s1 = inlined_call_operand.vmem [shape: f32[1,2048], index: 1, kind: input, shape index: {}]   ;;  %s83_s2 = inlined_call_operand.vmem [shape: f32[1,2048], index: 2, kind: output, shape index: {0}]   ;;  %s84_s3 = inlined_call_operand.vmem [shape: f32[1,2048], index: 3, kind: output, shape index: {1}]  }
   0x1   :  { %v13_v0 = vld [vmem:[%s81_s0] sm:$0xff]  ;;  %v14_v1 = vld [vmem:[%s81_s0 + $0x8] sm:$0xff] }
   0x2   :  { %v21_v2 = vld [vmem:[%s82_s1] sm:$0xff]  ;;  %v15_v3 = vmul.f32 %v13_v0, %v13_v0  ;;  %v16_v4 = vmul.f32 %v14_v1, %v14_v1  ;;  %v22_v6 = vld [vmem:[%s82_s1 + $0x8] sm:$0xff] }
   0x3   :  { %v23_v5 = vmul.f32 %v21_v2, %v21_v2  ;;  %v24_v7 = vmul.f32 %v22_v6, %v22_v6 }
   0x4   :  { %v17_v8 = vmul.f32 1.926252, %v15_v3  ;;  %v18_v9 = vmul.f32 1.926252, %v16_v4 }
   0x5   :  { %v25_v10 = vmul.f32 1.926252, %v23_v5  ;;  %v26_v11 = vmul.f32 1.926252, %v24_v7 }
   0x6   :  { %19 = vst [vmem:[%s83_s2] sm:$0xff] %v17_v8 }
   0x7   :  { %20 = vst [vmem:[%s83_s2 + $0x8] sm:$0xff] %v18_v9 }
   0x8   :  { %27 = vst [vmem:[%s84_s3] sm:$0xff] %v25_v10 }
   0x9   :  { %28 = vst [vmem:[%s84_s3 + $0x8] sm:$0xff] %v26_v11 }

</bundles_post_ra>
